<compile_context>
chip_gen: v6e
topology: v6e:2x2x1
jax: 0.10.0
libtpu: 0.0.40
codegen_flags: <defaults>
</compile_context>

<pallas_src>
import functools
import math

import jax
import jax.numpy as jnp
from jax.experimental import pallas as pl
from jax.experimental.pallas import tpu as pltpu

_LANE = 128
_BF16_SUBLANE = 16  # bf16 packs 16 rows per sublane group


def _round_up(x, m):
    return ((x + m - 1) // m) * m


def _apply_activation(y, act):
    if act == "ReLU":
        return jnp.maximum(y, 0.0)
    if act == "Sigmoid":
        return jax.nn.sigmoid(y)
    if act == "Tanh":
        return jnp.tanh(y)
    return y  # 'None' -> identity


def _query_vmem_capacity():
    try:
        return int(pltpu.get_tpu_info().vmem_capacity_bytes)
    except Exception:
        return 64 * 1024 * 1024  # conservative fallback (v7x per-core size)


def _fused_mlp_kernel(x_ref, *refs, activations, out_width):
    """Fused MLP group: all layers of the group in one kernel invocation.

    refs = (w_0, b_0, w_1, b_1, ..., w_{L-1}, b_{L-1}, o_ref)
    Intermediate activations stay on-chip (vregs/VMEM) across the unrolled
    layer loop -> zero HBM traffic between layers.
    """
    num_layers = len(activations)
    w_refs = refs[0:2 * num_layers:2]
    b_refs = refs[1:2 * num_layers:2]
    o_ref = refs[2 * num_layers]

    h = x_ref[...]  # bf16, (tb, in_width); in_width may be < 128 (masked load)
    for l in range(num_layers):
        # MXU matmul in bf16 with f32 accumulation.
        y = jnp.dot(h, w_refs[l][...], preferred_element_type=jnp.float32)
        y = y + b_refs[l][...]           # (1, p_out) broadcasts over the tile
        y = _apply_activation(y, activations[l])   # f32 epilogue (v5e-safe)
        if l == num_layers - 1:
            # Store only the real output lanes of this group.
            o_ref[...] = y[:, :out_width].astype(o_ref.dtype)
        else:
            h = y.astype(jnp.bfloat16)   # feed next MXU matmul in bf16


class CustomizableRENNPallas:
    """JAX/Pallas port of CustomizableRENN.

    Only the Linear path of getLayer() is implemented.
    # TODO(synk): Conv2d branch of getLayer() is constructed with invalid args
    # (missing kernel_size) in the reference and is therefore unused.
    """

    def __init__(self, input_size, hidden_layers, output_size, key):
        self.input_size = int(input_size)
        self.output_size = int(output_size)
        self.hidden_layers = hidden_layers
        self.num_layers = len(hidden_layers)
        self.activations = tuple(h[2] for h in hidden_layers)

        # Real (unpadded) layer dims, exactly as the torch module wires them.
        dims = [self.input_size]
        for layer in range(self.num_layers):
            out_dim = (self.output_size if layer == self.num_layers - 1
                       else hidden_layers[layer][1])
            dims.append(int(out_dim))
        self.dims = dims
        # Lane-padded dims (multiples of 128) for every layer OUTPUT (and for
        # layer inputs beyond the first).  The first layer keeps its real
        # (unpadded) contraction dim so x never has to be lane-padded.
        # TODO(synk): for very large hidden dims on v6e/v7x (2x256 MXU),
        # padding to 256 instead of 128 would fill the MXU better.
        self.pdims = [_round_up(d, _LANE) for d in dims]

        self.weights = []     # bf16 [K, out_pad], zero-padded (K unpadded for layer 0)
        self.biases = []      # f32  [1, out_pad], zero-padded
        self.ref_params = []  # unpadded f32 (w, b, act) for reference checks
        for layer in range(self.num_layers):
            d_in, d_out = dims[layer], dims[layer + 1]
            k_dim = d_in if layer == 0 else self.pdims[layer]
            p_out = self.pdims[layer + 1]
            key, wk, bk = jax.random.split(key, 3)
            bound = 1.0 / math.sqrt(float(d_in))
            w = jax.random.uniform(wk, (d_in, d_out), jnp.float32, -bound, bound)
            b = jax.random.uniform(bk, (1, d_out), jnp.float32, -bound, bound)
            # Zero-padded weight rows/cols guarantee padding lanes (even
            # Sigmoid(0)=0.5 in pad lanes of a previous layer) never
            # contaminate real output lanes.
            w_pad = jnp.zeros((k_dim, p_out), jnp.bfloat16)
            w_pad = w_pad.at[:d_in, :d_out].set(w.astype(jnp.bfloat16))
            b_pad = jnp.zeros((1, p_out), jnp.float32).at[:, :d_out].set(b)
            self.weights.append(w_pad)
            self.biases.append(b_pad)
            self.ref_params.append((w, b, self.activations[layer]))

        # ---- generation-aware VMEM budget (leave headroom under physical) ---
        # ~56 MiB on 64 MiB parts (v7x), ~112 MiB on 128 MiB parts (v5e/v6e).
        self.vmem_cap = _query_vmem_capacity()
        self.vmem_budget = self.vmem_cap - max(4 << 20, self.vmem_cap // 8)

        # ---- split layers into groups whose resident weights fit in VMEM ----
        io_reserve = 8 << 20  # batch-tile i/o buffers + Mosaic internal scratch
        weight_budget = max(self.vmem_budget - io_reserve, 8 << 20)
        groups, cur, cur_bytes = [], [], 0
        for l in range(self.num_layers):
            lb = self.weights[l].size * 2 + self.biases[l].size * 4
            if cur and cur_bytes + lb > weight_budget:
                groups.append(cur)
                cur, cur_bytes = [], 0
            # TODO(synk): a single layer larger than the VMEM weight budget
            # would additionally need K/N tiling of its matmul; it is placed
            # in its own group here.
            cur.append(l)
            cur_bytes += lb
        if cur:
            groups.append(cur)
        self.groups = groups

    # ------------------------------------------------------------------ #
    def _run_group(self, h, group, tb, nb, b_pad, out_width, out_dtype):
        """One fused pallas_call over the layers in `group`."""
        in_width = h.shape[1]
        acts = tuple(self.activations[l] for l in group)
        out_itemsize = 4 if out_dtype == jnp.float32 else 2

        # Input tile: real (unpadded) width, double-buffered by default.
        # (If profiling shows the x DMA exposed, pl.Buffered(3) here helps.)
        in_specs = [pl.BlockSpec((tb, in_width), lambda i: (i, 0))]
        inputs = [h]
        resident_bytes = 0
        for l in group:
            w, b = self.weights[l], self.biases[l]
            # Constant index_map + single buffer: fetched once, VMEM-resident,
            # and only 1x (not 2x) its size in VMEM.
            in_specs.append(pl.BlockSpec(w.shape, lambda i: (0, 0),
                                         pipeline_mode=pl.Buffered(1)))
            in_specs.append(pl.BlockSpec(b.shape, lambda i: (0, 0),
                                         pipeline_mode=pl.Buffered(1)))
            inputs.append(w)
            inputs.append(b)
            resident_bytes += w.size * 2 + b.size * 4

        # Advisory cost estimate for the XLA scheduler.
        flops = 2 * b_pad * sum(self.weights[l].shape[0] * self.weights[l].shape[1]
                                for l in group)
        transcendentals = b_pad * sum(
            self.pdims[l + 1] for l in group
            if self.activations[l] in ("Sigmoid", "Tanh"))
        bytes_accessed = (b_pad * in_width * 2 + resident_bytes
                          + b_pad * out_width * out_itemsize)

        return pl.pallas_call(
            functools.partial(_fused_mlp_kernel,
                              activations=acts, out_width=out_width),
            out_shape=jax.ShapeDtypeStruct((b_pad, out_width), out_dtype),
            grid=(nb,),
            in_specs=in_specs,
            out_specs=pl.BlockSpec((tb, out_width), lambda i: (i, 0)),
            compiler_params=pltpu.CompilerParams(
                dimension_semantics=("parallel",),
                vmem_limit_bytes=int(self.vmem_budget)),
            cost_estimate=pl.CostEstimate(
                flops=flops,
                transcendentals=transcendentals,
                bytes_accessed=bytes_accessed),
        )(*inputs)

    # ------------------------------------------------------------------ #
    def __call__(self, x, *, batch_tile=None):
        if self.num_layers == 0:
            return x  # edge case: empty stack -> identity (matches torch forward)

        batch = x.shape[0]

        # ---- batch tile selection -------------------------------------
        # Big tiles amortise the ~0.35us per-grid-step overhead; 1024 rows on
        # 128 MiB-VMEM parts (v5e/v6e), 512 on 64 MiB parts (v7x).  Keep >=2
        # grid steps whenever the batch allows so v7x's two TensorCores can
        # both be used (harmless on single-TC chips).
        big_tile = 1024 if self.vmem_cap >= (100 << 20) else 512
        if batch_tile is None:
            if batch >= 2 * big_tile:
                tb = big_tile
            elif batch >= 2 * _BF16_SUBLANE:
                tb = _round_up(pl.cdiv(batch, 2), _BF16_SUBLANE)
            else:
                tb = _round_up(batch, _BF16_SUBLANE)
        else:
            tb = _round_up(int(batch_tile), _BF16_SUBLANE)
        b_pad = _round_up(batch, tb)
        nb = b_pad // tb

        # ---- input prep: cast to bf16, pad batch ROWS only (width stays
        #      the real input_size -> no lane-padded HBM copy of x). ------
        h = x.astype(jnp.bfloat16)
        if b_pad != batch:
            h = jnp.zeros((b_pad, self.input_size), jnp.bfloat16).at[:batch].set(h)

        # ---- run the (usually single) fused group(s) -------------------
        n_groups = len(self.groups)
        for gi, group in enumerate(self.groups):
            last = gi == n_groups - 1
            if last:
                out_width, out_dtype = self.output_size, jnp.float32
            else:
                # Lane-dense bf16 intermediate between groups.
                out_width, out_dtype = self.pdims[group[-1] + 1], jnp.bfloat16
            h = self._run_group(h, group, tb, nb, b_pad, out_width, out_dtype)

        return h[:batch] if b_pad != batch else h


if __name__ == "__main__":
    # Small deterministic example consistent with the module's forward.
    batch = 8
    input_size = 16
    output_size = 10
    hidden_layers = [
        ("Linear", 32, "ReLU"),
        ("Linear", 64, "Tanh"),
        ("Linear", 32, "Sigmoid"),
        ("Linear", 10, "None"),  # last layer -> output_size, no activation
    ]

    key = jax.random.PRNGKey(0)
    key, xk = jax.random.split(key)
    x = jax.random.normal(xk, (batch, input_size), jnp.float32)

    model = CustomizableRENNPallas(input_size, hidden_layers, output_size, key)
    out = jax.block_until_ready(model(x))
    assert out.shape == (batch, output_size)

    # Reference 1: emulate the kernel's bf16-in / f32-accumulate arithmetic.
    ref_bf16 = x
    for w, b, act in model.ref_params:
        hf = ref_bf16.astype(jnp.bfloat16).astype(jnp.float32)
        wf = w.astype(jnp.bfloat16).astype(jnp.float32)
        ref_bf16 = _apply_activation(hf @ wf + b, act)
    assert jnp.allclose(out, ref_bf16, atol=1e-2, rtol=1e-2)

    # Reference 2: pure f32 forward (semantic check, looser tolerance for bf16).
    ref_f32 = x
    for w, b, act in model.ref_params:
        ref_f32 = _apply_activation(ref_f32 @ w + b, act)
    assert jnp.allclose(out, ref_f32, atol=5e-2, rtol=5e-2)

    print("KERNEL_OK")
</pallas_src>

<mosaic_0001>
module attributes {stable_mosaic.version = 11 : i64} {
  func.func @_fused_mlp_kernel(%arg0: i32, %arg1: memref<16x16xbf16, #tpu.memory_space<vmem>>, %arg2: memref<16x128xbf16, #tpu.memory_space<vmem>>, %arg3: memref<1x128xf32, #tpu.memory_space<vmem>>, %arg4: memref<128x128xbf16, #tpu.memory_space<vmem>>, %arg5: memref<1x128xf32, #tpu.memory_space<vmem>>, %arg6: memref<128x128xbf16, #tpu.memory_space<vmem>>, %arg7: memref<1x128xf32, #tpu.memory_space<vmem>>, %arg8: memref<128x128xbf16, #tpu.memory_space<vmem>>, %arg9: memref<1x128xf32, #tpu.memory_space<vmem>>, %arg10: memref<16x10xf32, #tpu.memory_space<vmem>>) attributes {dimension_semantics = [#tpu.dimension_semantics<parallel>], iteration_bounds = array<i64: 1>, scalar_prefetch = 0 : i64, scratch_operands = 0 : i64, tpu.core_type = #tpu.core_type<tc>, window_params = [{transform_indices = @transform_0, window_bounds = array<i64: 16, 16>}, {pipeline_mode = #tpu.pipeline_mode<synchronous>, transform_indices = @transform_1, window_bounds = array<i64: 16, 128>}, {pipeline_mode = #tpu.pipeline_mode<synchronous>, transform_indices = @transform_2, window_bounds = array<i64: 1, 128>}, {pipeline_mode = #tpu.pipeline_mode<synchronous>, transform_indices = @transform_3, window_bounds = array<i64: 128, 128>}, {pipeline_mode = #tpu.pipeline_mode<synchronous>, transform_indices = @transform_4, window_bounds = array<i64: 1, 128>}, {pipeline_mode = #tpu.pipeline_mode<synchronous>, transform_indices = @transform_5, window_bounds = array<i64: 128, 128>}, {pipeline_mode = #tpu.pipeline_mode<synchronous>, transform_indices = @transform_6, window_bounds = array<i64: 1, 128>}, {pipeline_mode = #tpu.pipeline_mode<synchronous>, transform_indices = @transform_7, window_bounds = array<i64: 128, 128>}, {pipeline_mode = #tpu.pipeline_mode<synchronous>, transform_indices = @transform_8, window_bounds = array<i64: 1, 128>}, {transform_indices = @transform_9, window_bounds = array<i64: 16, 10>}]} {
    %c0 = arith.constant 0 : index
    %c0_0 = arith.constant 0 : index
    %0 = vector.load %arg1[%c0, %c0_0] : memref<16x16xbf16, #tpu.memory_space<vmem>>, vector<16x16xbf16>
    %c0_1 = arith.constant 0 : index
    %c0_2 = arith.constant 0 : index
    %1 = vector.load %arg2[%c0_1, %c0_2] : memref<16x128xbf16, #tpu.memory_space<vmem>>, vector<16x128xbf16>
    %cst = arith.constant dense<0.000000e+00> : vector<16x128xf32>
    %2 = tpu.matmul %0, %1, %cst {dimension_numbers = #tpu.dot_dimension_numbers<[1], [0], [0], [1], [0, 0, 1, 1], [], []>} : vector<16x16xbf16>, vector<16x128xbf16>, vector<16x128xf32> -> vector<16x128xf32>
    %c0_3 = arith.constant 0 : index
    %c0_4 = arith.constant 0 : index
    %3 = vector.load %arg3[%c0_3, %c0_4] : memref<1x128xf32, #tpu.memory_space<vmem>>, vector<1x128xf32>
    %4 = vector.broadcast %3 : vector<1x128xf32> to vector<16x128xf32>
    %5 = arith.addf %2, %4 : vector<16x128xf32>
    %cst_5 = arith.constant 0.000000e+00 : f32
    %6 = vector.broadcast %cst_5 : f32 to vector<16x128xf32>
    %7 = arith.maximumf %5, %6 : vector<16x128xf32>
    %8 = arith.truncf %7 : vector<16x128xf32> to vector<16x128xbf16>
    %c0_6 = arith.constant 0 : index
    %c0_7 = arith.constant 0 : index
    %9 = vector.load %arg4[%c0_6, %c0_7] : memref<128x128xbf16, #tpu.memory_space<vmem>>, vector<128x128xbf16>
    %cst_8 = arith.constant dense<0.000000e+00> : vector<16x128xf32>
    %10 = tpu.matmul %8, %9, %cst_8 {dimension_numbers = #tpu.dot_dimension_numbers<[1], [0], [0], [1], [0, 0, 1, 1], [], []>} : vector<16x128xbf16>, vector<128x128xbf16>, vector<16x128xf32> -> vector<16x128xf32>
    %c0_9 = arith.constant 0 : index
    %c0_10 = arith.constant 0 : index
    %11 = vector.load %arg5[%c0_9, %c0_10] : memref<1x128xf32, #tpu.memory_space<vmem>>, vector<1x128xf32>
    %12 = vector.broadcast %11 : vector<1x128xf32> to vector<16x128xf32>
    %13 = arith.addf %10, %12 : vector<16x128xf32>
    %14 = math.tanh %13 : vector<16x128xf32>
    %15 = arith.truncf %14 : vector<16x128xf32> to vector<16x128xbf16>
    %c0_11 = arith.constant 0 : index
    %c0_12 = arith.constant 0 : index
    %16 = vector.load %arg6[%c0_11, %c0_12] : memref<128x128xbf16, #tpu.memory_space<vmem>>, vector<128x128xbf16>
    %cst_13 = arith.constant dense<0.000000e+00> : vector<16x128xf32>
    %17 = tpu.matmul %15, %16, %cst_13 {dimension_numbers = #tpu.dot_dimension_numbers<[1], [0], [0], [1], [0, 0, 1, 1], [], []>} : vector<16x128xbf16>, vector<128x128xbf16>, vector<16x128xf32> -> vector<16x128xf32>
    %c0_14 = arith.constant 0 : index
    %c0_15 = arith.constant 0 : index
    %18 = vector.load %arg7[%c0_14, %c0_15] : memref<1x128xf32, #tpu.memory_space<vmem>>, vector<1x128xf32>
    %19 = vector.broadcast %18 : vector<1x128xf32> to vector<16x128xf32>
    %20 = arith.addf %17, %19 : vector<16x128xf32>
    %21 = arith.negf %20 : vector<16x128xf32>
    %22 = math.exp %21 : vector<16x128xf32>
    %cst_16 = arith.constant 1.000000e+00 : f32
    %23 = vector.broadcast %cst_16 : f32 to vector<16x128xf32>
    %24 = arith.addf %23, %22 : vector<16x128xf32>
    %25 = arith.divf %23, %24 : vector<16x128xf32>
    %26 = arith.truncf %25 : vector<16x128xf32> to vector<16x128xbf16>
    %c0_17 = arith.constant 0 : index
    %c0_18 = arith.constant 0 : index
    %27 = vector.load %arg8[%c0_17, %c0_18] : memref<128x128xbf16, #tpu.memory_space<vmem>>, vector<128x128xbf16>
    %cst_19 = arith.constant dense<0.000000e+00> : vector<16x128xf32>
    %28 = tpu.matmul %26, %27, %cst_19 {dimension_numbers = #tpu.dot_dimension_numbers<[1], [0], [0], [1], [0, 0, 1, 1], [], []>} : vector<16x128xbf16>, vector<128x128xbf16>, vector<16x128xf32> -> vector<16x128xf32>
    %c0_20 = arith.constant 0 : index
    %c0_21 = arith.constant 0 : index
    %29 = vector.load %arg9[%c0_20, %c0_21] : memref<1x128xf32, #tpu.memory_space<vmem>>, vector<1x128xf32>
    %30 = vector.broadcast %29 : vector<1x128xf32> to vector<16x128xf32>
    %31 = arith.addf %28, %30 : vector<16x128xf32>
    %32 = vector.extract_strided_slice %31 {offsets = [0, 0], sizes = [16, 10], strides = [1, 1]} : vector<16x128xf32> to vector<16x10xf32>
    %c0_22 = arith.constant 0 : index
    %c0_23 = arith.constant 0 : index
    %33 = vector.load %arg10[%c0_22, %c0_23] : memref<16x10xf32, #tpu.memory_space<vmem>>, vector<16x10xf32>
    tpu.vector_store %arg10[%c0_22, %c0_23], %32 {strides = array<i32>} : memref<16x10xf32, #tpu.memory_space<vmem>>, vector<16x10xf32>,
    return
  }
  func.func @transform_0(%arg0: i32) -> (i32, i32) {
    %c0_i32 = arith.constant 0 : i32
    %c0_i32_0 = arith.constant 0 : i32
    return %arg0, %c0_i32 : i32, i32
  }
  func.func @transform_1(%arg0: i32) -> (i32, i32) {
    %c0_i32 = arith.constant 0 : i32
    %c0_i32_0 = arith.constant 0 : i32
    %c0_i32_1 = arith.constant 0 : i32
    return %c0_i32, %c0_i32_0 : i32, i32
  }
  func.func @transform_2(%arg0: i32) -> (i32, i32) {
    %c0_i32 = arith.constant 0 : i32
    %c0_i32_0 = arith.constant 0 : i32
    %c0_i32_1 = arith.constant 0 : i32
    return %c0_i32, %c0_i32_0 : i32, i32
  }
  func.func @transform_3(%arg0: i32) -> (i32, i32) {
    %c0_i32 = arith.constant 0 : i32
    %c0_i32_0 = arith.constant 0 : i32
    %c0_i32_1 = arith.constant 0 : i32
    return %c0_i32, %c0_i32_0 : i32, i32
  }
  func.func @transform_4(%arg0: i32) -> (i32, i32) {
    %c0_i32 = arith.constant 0 : i32
    %c0_i32_0 = arith.constant 0 : i32
    %c0_i32_1 = arith.constant 0 : i32
    return %c0_i32, %c0_i32_0 : i32, i32
  }
  func.func @transform_5(%arg0: i32) -> (i32, i32) {
    %c0_i32 = arith.constant 0 : i32
    %c0_i32_0 = arith.constant 0 : i32
    %c0_i32_1 = arith.constant 0 : i32
    return %c0_i32, %c0_i32_0 : i32, i32
  }
  func.func @transform_6(%arg0: i32) -> (i32, i32) {
    %c0_i32 = arith.constant 0 : i32
    %c0_i32_0 = arith.constant 0 : i32
    %c0_i32_1 = arith.constant 0 : i32
    return %c0_i32, %c0_i32_0 : i32, i32
  }
  func.func @transform_7(%arg0: i32) -> (i32, i32) {
    %c0_i32 = arith.constant 0 : i32
    %c0_i32_0 = arith.constant 0 : i32
    %c0_i32_1 = arith.constant 0 : i32
    return %c0_i32, %c0_i32_0 : i32, i32
  }
  func.func @transform_8(%arg0: i32) -> (i32, i32) {
    %c0_i32 = arith.constant 0 : i32
    %c0_i32_0 = arith.constant 0 : i32
    %c0_i32_1 = arith.constant 0 : i32
    return %c0_i32, %c0_i32_0 : i32, i32
  }
  func.func @transform_9(%arg0: i32) -> (i32, i32) {
    %c0_i32 = arith.constant 0 : i32
    %c0_i32_0 = arith.constant 0 : i32
    return %arg0, %c0_i32 : i32, i32
  }
}

</mosaic_0001>

<bundles_post_ra>
// kernel: tpu_custom_call.1
= control target key start
LH: loop header
LB: loop body
LE: loop exit
PB: predicated region body
PF: predicated region fallthrough
CT: control target
= control target key end

     0   :  { %14 = vsyncpa [#allocation3], 0  ;;  %s992_s0 = inlined_call_operand.hbm [shape: bf16[16,16], index: 0, kind: input, shape index: {}]   ;;  %s993_s1 = inlined_call_operand.hbm [shape: bf16[16,128], index: 1, kind: input, shape index: {}]   ;;  %s994_s2 = inlined_call_operand.vmem [shape: f32[1,128], index: 2, kind: input, shape index: {}]   ;;  %s995_s3 = inlined_call_operand.hbm [shape: bf16[128,128], index: 3, kind: input, shape index: {}]   ;;  %s996_s4 = inlined_call_operand.vmem [shape: f32[1,128], index: 4, kind: input, shape index: {}]   ;;  %s997_s5 = inlined_call_operand.hbm [shape: bf16[128,128], index: 5, kind: input, shape index: {}]   ;;  %s998_s6 = inlined_call_operand.vmem [shape: f32[1,128], index: 6, kind: input, shape index: {}]   ;;  %s999_s7 = inlined_call_operand.hbm [shape: bf16[128,128], index: 7, kind: input, shape index: {}]   ;;  %s1000_s8 = inlined_call_operand.vmem [shape: f32[1,128], index: 8, kind: input, shape index: {}]   ;;  %s1001_s9 = inlined_call_operand.hbm [shape: f32[16,10], index: 9, kind: output, shape index: {}]  }
   0x1   :  { %15 = vsyncpa [#allocation6], 0 }
   0x2   :  { %16 = vsyncpa [#allocation9], 0 }
   0x3   :  { %17 = vsyncpa [#allocation4], 0  ;;  %s852_s30 = smov [#allocation5]   ;;  %s853_s11 = smov [#allocation8]  }
   0x4   :  { %s35_s10 = sshll.u32 %s852_s30, 4  ;;  %s63_s12 = sshll.u32 %s853_s11, 4  ;;  %s36_s10 = int_to_ptr.vmem [resolvable:$true] %s35_s10  ;;  %s64_s12 = int_to_ptr.vmem [resolvable:$true] %s63_s12 }
   0x5   :  { %s732_s13 = scalar_lea.vmem %s36_s10, 128  ;;  %p737_p1 = scmp.lt.s32.totalorder %s36_s10, %s36_s10 }
   0x6   :  { %p733_p0 = scmp.ne.s32.totalorder %s36_s10, %s732_s13  ;;  %p738_p2 = scmp.lt.s32.totalorder %s732_s13, %s732_s13 }
   0x8   :  { %p739_p3 = por %p738_p2, %p737_p1 }
   0xa   :  { %p740_p4 = pnand %p739_p3, %p733_p0 }
   0xc   :  { %743 = shalt.err (!%p740_p4)
}
   0xd   :  { %s854_s14 = smov 64   ;;  %s855_s15 = smov 4  }
   0xe   :  { %41 = dma.hbm_to_vmem [thread:$0]  %s993_s1, 128, %s36_s10, [#allocation6], %s854_s14, %s854_s14, %s855_s15  }
   0xf   :  { %s752_s18 = scalar_lea.vmem %s64_s12, 1024  ;;  %p757_p6 = scmp.lt.s32.totalorder %s64_s12, %s64_s12 }
  0x10   :  { %p753_p5 = scmp.ne.s32.totalorder %s64_s12, %s752_s18  ;;  %p758_p7 = scmp.lt.s32.totalorder %s752_s18, %s752_s18 }
  0x12   :  { %p759_p8 = por %p758_p7, %p757_p6 }
  0x14   :  { %p760_p9 = pnand %p759_p8, %p753_p5 }
  0x16   :  { %763 = shalt.err (!%p760_p9)
}
  0x17   :  { %69 = dma.hbm_to_vmem [thread:$0]  %s997_s5, 1024, %s64_s12, [#allocation9], %s854_s14, %s854_s14, %s855_s15  }
  0x18   :  { %s856_s21 = smov [#allocation2]   ;;  %s857_s23 = smov [#allocation7]  }
  0x19   :  { %s23_s22 = sshll.u32 %s856_s21, 4  ;;  %s49_s24 = sshll.u32 %s857_s23, 4  ;;  %s24_s22 = int_to_ptr.vmem [resolvable:$true] %s23_s22  ;;  %s50_s24 = int_to_ptr.vmem [resolvable:$true] %s49_s24 }
  0x1a   :  { %s772_s1 = scalar_lea.vmem %s24_s22, 128  ;;  %p777_p11 = scmp.lt.s32.totalorder %s24_s22, %s24_s22 }
  0x1b   :  { %p773_p10 = scmp.ne.s32.totalorder %s24_s22, %s772_s1  ;;  %p778_p12 = scmp.lt.s32.totalorder %s772_s1, %s772_s1 }
  0x1d   :  { %p779_p13 = por %p778_p12, %p777_p11 }
  0x1f   :  { %p780_p0 = pnand %p779_p13, %p773_p10 }
  0x21   :  { %783 = shalt.err (!%p780_p0)
}
  0x22   :  { %29 = dma.hbm_to_vmem [thread:$0]  %s992_s0, 128, %s24_s22, [#allocation3], %s854_s14, %s854_s14, %s855_s15  }
  0x23   :  { %s792_s5 = scalar_lea.vmem %s50_s24, 1024  ;;  %p797_p2 = scmp.lt.s32.totalorder %s50_s24, %s50_s24 }
  0x24   :  { %p793_p1 = scmp.ne.s32.totalorder %s50_s24, %s792_s5  ;;  %p798_p3 = scmp.lt.s32.totalorder %s792_s5, %s792_s5 }
  0x26   :  { %p799_p4 = por %p798_p3, %p797_p2 }
  0x28   :  { %p800_p5 = pnand %p799_p4, %p793_p1 }
  0x2a   :  { %803 = shalt.err (!%p800_p5)
}
  0x2b   :  { %55 = dma.hbm_to_vmem [thread:$0]  %s995_s3, 1024, %s50_s24, [#allocation6], %s854_s14, %s854_s14, %s855_s15  }
  0x2c   :  { %s858_s29 = smov [#allocation10]  }
  0x2d   :  { %s77_s30 = sshll.u32 %s858_s29, 4  ;;  %s78_s30 = int_to_ptr.vmem [resolvable:$true] %s77_s30 }
  0x2e   :  { %s812_s10 = scalar_lea.vmem %s78_s30, 1024  ;;  %p817_p7 = scmp.lt.s32.totalorder %s78_s30, %s78_s30 }
  0x2f   :  { %p813_p6 = scmp.ne.s32.totalorder %s78_s30, %s812_s10  ;;  %p818_p8 = scmp.lt.s32.totalorder %s812_s10, %s812_s10 }
  0x31   :  { %p819_p9 = por %p818_p8, %p817_p7 }
  0x33   :  { %p820_p10 = pnand %p819_p9, %p813_p6 }
  0x35   :  { %823 = shalt.err (!%p820_p10)
}
  0x36   :  { %83 = dma.hbm_to_vmem [thread:$0]  %s999_s7, 1024, %s78_s30, [#allocation9], %s854_s14, %s854_s14, %s855_s15  }
  0x37   :  { %844 = dma.done.wait [#allocation3], 128  }
  0x38   :  { %845 = vsyncadd [#allocation3], 4294967168 }
  0x39   :  { %846 = dma.done.wait [#allocation6], 1152  }
  0x3a   :  { %847 = vsyncadd [#allocation6], 4294966144 }
  0x3b   :  { %848 = dma.done.wait [#allocation9], 2048  }
  0x3c   :  { %849 = vsyncadd [#allocation9], 4294965248  ;;  %v859_v0 = vmov 0.0   ;;  %vm860_vm0 = vmmov 0   ;;  %v686_v1 = vld [vmem:[#allocation5] sm:$0xff]   ;;  %v687_v2 = vld [vmem:[#allocation2] sm:$0xff]  }
  0x3d   :  { %608 = vmatprep.subr.bf16.mxu0 %v859_v0  ;;  %610 = vmatprep.mubr.msk.bf16.mxu0 %vm860_vm0, %v859_v0  ;;  %vm124_vm1 = vcmask 130048   ;;  %v688_v3 = vld [vmem:[#allocation7 + $0x38] sm:$0xff]   ;;  %v689_v4 = vld [vmem:[#allocation7 + $0x30] sm:$0xff]   ;;  %v690_v5 = vld [vmem:[#allocation7 + $0x28] sm:$0xff]   ;;  %vm524_vm2 = vcmask 80896   ;;  %s861_s15 = smov [#allocation11]  }
  0x3e   :  { %614 = vmatprep.subr.bf16.mxu1 %v859_v0  ;;  %630 = vmatprep.mubr.msk.bf16.mxu1 %vm860_vm0, %v859_v0  ;;  %v691_v6 = vld [vmem:[#allocation7 + $0x20] sm:$0xff]   ;;  %v692_v7 = vld [vmem:[#allocation7 + $0x18] sm:$0xff]   ;;  %v693_v8 = vld [vmem:[#allocation7 + $0x10] sm:$0xff]   ;;  %s532_s16 = sshll.u32 %s861_s15, 4  ;;  %s533_s16 = int_to_ptr.vmem [resolvable:$true] %s532_s16 }
  0x3f   :  { %609 = vmatpush3.bf16.msra.mxu0 %v686_v1  ;;  %615 = vmatpush3.bf16.msra.mxu1 %v688_v3  ;;  %v694_v9 = vld [vmem:[#allocation7 + $0x8] sm:$0xff]   ;;  %v695_v10 = vld [vmem:[#allocation7] sm:$0xff]   ;;  %v696_v11 = vld [vmem:[#allocation8 + $0x38] sm:$0xff]   ;;  %s824_s17 = scalar_lea.vmem %s533_s16, 256  ;;  %p829_p12 = scmp.lt.s32.totalorder %s533_s16, %s533_s16 }
  0x40   :  { %634 = vmatprep.subr.bf16.mxu0 %v859_v0  ;;  %616 = vmatprep.subr.bf16.mxu1 %v859_v0  ;;  %v697_v12 = vld [vmem:[#allocation8 + $0x30] sm:$0xff]   ;;  %v698_v23 = vld [vmem:[#allocation8 + $0x28] sm:$0xff]   ;;  %v699_v24 = vld [vmem:[#allocation8 + $0x20] sm:$0xff]   ;;  %p825_p11 = scmp.ne.s32.totalorder %s533_s16, %s824_s17  ;;  %p830_p13 = scmp.lt.s32.totalorder %s824_s17, %s824_s17 }
  0x41   :  { %v546_v13 = vld [vmem:[%s994_s2] ss:$0 sm:$0xff]  ;;  %v700_v25 = vld [vmem:[#allocation8 + $0x18] sm:$0xff]   ;;  %v702_v27 = vld [vmem:[#allocation8 + $0x8] sm:$0xff]  }
  0x42   :  { %611 = vmatmul.mubr.msk.bf16.vlgmr.msra.gmra.mxu0 %vm124_vm1, %v687_v2  ;;  %v701_v26 = vld [vmem:[#allocation8 + $0x10] sm:$0xff]   ;;  %v703_v28 = vld [vmem:[#allocation8] sm:$0xff]   ;;  %v704_v39 = vld [vmem:[#allocation10 + $0x38] sm:$0xff]   ;;  %p831_p0 = por %p830_p13, %p829_p12 }
  0x43   :  { %650 = vmatprep.mubr.msk.bf16.mxu0 %vm860_vm0, %v859_v0  ;;  %617 = vmatpush3.bf16.msra.mxu1 %v689_v4  ;;  %v550_v29 = vld [vmem:[%s996_s4] ss:$0 sm:$0xff]  ;;  %v706_v41 = vld [vmem:[#allocation10 + $0x28] sm:$0xff]   ;;  %v707_v42 = vld [vmem:[#allocation10 + $0x20] sm:$0xff]  }
  0x44   :  { %618 = vmatprep.subr.bf16.mxu1 %v859_v0  ;;  %635 = vmatpush3.bf16.msra.mxu0 %v696_v11  ;;  %v705_v40 = vld [vmem:[#allocation10 + $0x30] sm:$0xff]   ;;  %v708_v43 = vld [vmem:[#allocation10 + $0x18] sm:$0xff]   ;;  %v710_v45 = vld [vmem:[#allocation10 + $0x8] sm:$0xff]   ;;  %p832_p1 = pnand %p831_p0, %p825_p11 }
  0x45   :  { %636 = vmatprep.subr.bf16.mxu0 %v859_v0  ;;  %v709_v44 = vld [vmem:[#allocation10 + $0x10] sm:$0xff]   ;;  %v711_v46 = vld [vmem:[#allocation10] sm:$0xff]  }
  0x46   :  { %v559_v47 = vld [vmem:[%s998_s6] ss:$0 sm:$0xff] }
  0x47   :  { %619 = vmatpush3.bf16.msra.mxu1 %v690_v5  ;;  %v570_v63 = vld [vmem:[%s1000_s8] ss:$0 sm:$0xff] }
  0x48   :  { %620 = vmatprep.subr.bf16.mxu1 %v859_v0  ;;  %637 = vmatpush3.bf16.msra.mxu0 %v697_v12 }
  0x49   :  { %638 = vmatprep.subr.bf16.mxu0 %v859_v0 }
  0x4b   :  { %621 = vmatpush3.bf16.msra.mxu1 %v691_v6 }
  0x4c   :  { %622 = vmatprep.subr.bf16.mxu1 %v859_v0  ;;  %639 = vmatpush3.bf16.msra.mxu0 %v698_v23 }
  0x4d   :  { %640 = vmatprep.subr.bf16.mxu0 %v859_v0 }
  0x4f   :  { %623 = vmatpush3.bf16.msra.mxu1 %v692_v7 }
  0x50   :  { %624 = vmatprep.subr.bf16.mxu1 %v859_v0  ;;  %641 = vmatpush3.bf16.msra.mxu0 %v699_v24 }
  0x51   :  { %642 = vmatprep.subr.bf16.mxu0 %v859_v0 }
  0x53   :  { %625 = vmatpush3.bf16.msra.mxu1 %v693_v8 }
  0x54   :  { %626 = vmatprep.subr.bf16.mxu1 %v859_v0  ;;  %643 = vmatpush3.bf16.msra.mxu0 %v700_v25 }
  0x55   :  { %644 = vmatprep.subr.bf16.mxu0 %v859_v0 }
  0x57   :  { %627 = vmatpush3.bf16.msra.mxu1 %v694_v9 }
  0x58   :  { %628 = vmatprep.subr.bf16.mxu1 %v859_v0  ;;  %645 = vmatpush3.bf16.msra.mxu0 %v701_v26 }
  0x59   :  { %646 = vmatprep.subr.bf16.mxu0 %v859_v0 }
  0x5b   :  { %629 = vmatpush3.bf16.msra.mxu1 %v695_v10 }
  0x5c   :  { %654 = vmatprep.subr.bf16.mxu1 %v859_v0  ;;  %647 = vmatpush3.bf16.msra.mxu0 %v702_v27 }
  0x5d   :  { %648 = vmatprep.subr.bf16.mxu0 %v859_v0 }
  0x60   :  { %649 = vmatpush3.bf16.msra.mxu0 %v703_v28 }
 0x102   :  { %v162_v14 = vpop.f32.mrf.mxu0 }
 0x103   :  { %v163_v16 = vadd.f32 %v546_v13, %v162_v14 }
 0x104   :  { %v612_v15 = vpop.f32.mrf.mxu0 }
 0x105   :  { %v169_v20 = vmax.f32 %v163_v16, 0.0 }
 0x106   :  { %v165_v17 = vpop.f32.mrf.mxu0 }
 0x107   :  { %v166_v18 = vadd.f32 %v546_v13, %v165_v17 }
 0x108   :  { %v613_v19 = vpop.f32.mrf.mxu0 }
 0x109   :  { %v170_v21 = vmax.f32 %v166_v18, 0.0 }
 0x10b   :  { %v171_v22 = vpack.c.bf16 %v170_v21, %v169_v20 }
 0x10d   :  { %631 = vmatmul.mubr.bf16.vlgmr.msra.gmra.mxu1 %v171_v22 }
 0x10e   :  { %670 = vmatprep.mubr.msk.bf16.mxu1 %vm860_vm0, %v859_v0  ;;  %655 = vmatpush3.bf16.msra.mxu1 %v704_v39 }
 0x10f   :  { %656 = vmatprep.subr.bf16.mxu1 %v859_v0 }
 0x112   :  { %657 = vmatpush3.bf16.msra.mxu1 %v705_v40 }
 0x113   :  { %658 = vmatprep.subr.bf16.mxu1 %v859_v0 }
 0x116   :  { %659 = vmatpush3.bf16.msra.mxu1 %v706_v41 }
 0x117   :  { %660 = vmatprep.subr.bf16.mxu1 %v859_v0 }
 0x11a   :  { %661 = vmatpush3.bf16.msra.mxu1 %v707_v42 }
 0x11b   :  { %662 = vmatprep.subr.bf16.mxu1 %v859_v0 }
 0x11e   :  { %663 = vmatpush3.bf16.msra.mxu1 %v708_v43 }
 0x11f   :  { %664 = vmatprep.subr.bf16.mxu1 %v859_v0 }
 0x122   :  { %665 = vmatpush3.bf16.msra.mxu1 %v709_v44 }
 0x123   :  { %666 = vmatprep.subr.bf16.mxu1 %v859_v0 }
 0x126   :  { %667 = vmatpush3.bf16.msra.mxu1 %v710_v45 }
 0x127   :  { %668 = vmatprep.subr.bf16.mxu1 %v859_v0 }
 0x12a   :  { %669 = vmatpush3.bf16.msra.mxu1 %v711_v46 }
 0x1cd   :  { %v277_v30 = vpop.f32.mrf.mxu1 }
 0x1ce   :  { %v278_v31 = vadd.f32 %v550_v29, %v277_v30 }
 0x1cf   :  { %v632_v32 = vpop.f32.mrf.mxu1 }
 0x1d0   :  { %712 = vtanh.f32 %v278_v31 }
 0x1d1   :  { %v280_v33 = vpop.f32.mrf.mxu1 }
 0x1d2   :  { %v281_v34 = vadd.f32 %v550_v29, %v280_v33 }
 0x1d3   :  { %v633_v35 = vpop.f32.mrf.mxu1 }
 0x1d4   :  { %714 = vtanh.f32 %v281_v34 }
 0x1dd   :  { %v713_v36 = vpop.eup %712 }
 0x1e1   :  { %v715_v37 = vpop.eup %714 }
 0x1e2   :  { %v286_v38 = vpack.c.bf16 %v715_v37, %v713_v36 }
 0x1e4   :  { %651 = vmatmul.mubr.bf16.vlgmr.msra.gmra.mxu0 %v286_v38 }
 0x2a4   :  { %v392_v48 = vpop.f32.mrf.mxu0 }
 0x2a5   :  { %v393_v49 = vadd.f32 %v559_v47, %v392_v48 }
 0x2a6   :  { %v652_v50 = vpop.f32.mrf.mxu0 }
 0x2a7   :  { %v568_v51 = vmul.f32 -1.442695, %v393_v49 }
 0x2a8   :  { %v395_v52 = vpop.f32.mrf.mxu0 }
 0x2a9   :  { %716 = vpow2.f32 %v568_v51  ;;  %v396_v53 = vadd.f32 %v559_v47, %v395_v52 }
 0x2aa   :  { %v653_v54 = vpop.f32.mrf.mxu0 }
 0x2ab   :  { %v569_v55 = vmul.f32 -1.442695, %v396_v53 }
 0x2ad   :  { %718 = vpow2.f32 %v569_v55 }
 0x2b6   :  { %v717_v56 = vpop.eup %716 }
 0x2b7   :  { %v405_v57 = vadd.f32 1.0, %v717_v56 }
 0x2b9   :  { %720 = vrcp.f32 %v405_v57 }
 0x2ba   :  { %v719_v58 = vpop.eup %718 }
 0x2bb   :  { %v406_v59 = vadd.f32 1.0, %v719_v58 }
 0x2bd   :  { %722 = vrcp.f32 %v406_v59 }
 0x2c6   :  { %v721_v60 = vpop.eup %720 }
 0x2ca   :  { %v723_v61 = vpop.eup %722 }
 0x2cb   :  { %v411_v62 = vpack.c.bf16 %v723_v61, %v721_v60 }
 0x2cd   :  { %671 = vmatmul.mubr.bf16.vlgmr.msra.gmra.mxu1 %v411_v62 }
 0x38d   :  { %v517_v0 = vpop.f32.mrf.mxu1 }
 0x38e   :  { %v518_v1 = vadd.f32 %v570_v63, %v517_v0 }
 0x38f   :  { %v672_v2 = vpop.f32.mrf.mxu1 }
 0x390   :  { %525 = vst.msk [vmem:[#allocation11] sm:$0xff] %vm524_vm2, %v518_v1 }
 0x391   :  { %v520_v3 = vpop.f32.mrf.mxu1 }
 0x392   :  { %v521_v4 = vadd.f32 %v570_v63, %v520_v3 }
 0x393   :  { %v673_v5 = vpop.f32.mrf.mxu1 }
 0x394   :  { %526 = vst.msk [vmem:[#allocation11 + $0x8] sm:$0xff] %vm524_vm2, %v521_v4 }
 0x395   :  { %835 = shalt.err (!%p832_p1)
}
 0x396   :  { %s862_s8 = smov 128   ;;  %s863_s18 = smov 8  }
 0x397   :  { %538 = dma.vmem_to_hbm [thread:$0]  %s533_s16, 256, %s1001_s9, [#allocation4], %s862_s8, %s862_s8, %s863_s18  }
 0x398   :  { %850 = dma.done.wait [#allocation4], 256  }
 0x399   :  { %851 = vsyncadd [#allocation4], 4294967040 }
 0x39a   :  { %542 = vsyncpa [#allocation3], 1 }
 0x39b   :  { %543 = vsyncpa [#allocation6], 1 }
 0x39c   :  { %544 = vsyncpa [#allocation9], 1 }
 0x39d   :  { %545 = vsyncpa [#allocation4], 1 }

</bundles_post_ra>
